<compile_context>
chip_gen: v6e
topology: v6e:2x2x1
jax: 0.10.0
libtpu: 0.0.40
codegen_flags: <defaults>
</compile_context>

<pallas_src>
import jax
import jax.numpy as jnp
from jax.experimental import pallas as pl
from jax.experimental.pallas import tpu as pltpu


def _round_up(x, m):
    return (x + m - 1) // m * m


def _pick_tile(hw, cap=4096):
    """Largest multiple of 128 (<= cap) that divides the 128-padded spatial size."""
    hw128 = _round_up(hw, 128)
    tile = 128
    t = 128
    while t <= min(hw128, cap):
        if hw128 % t == 0:
            tile = t
        t += 128
    return tile, hw128


def dynamics_kernel(s_ref, wsT_ref, act_ref, out_ref):
    # s_ref:   (C, T)  state tile, channels-first; spatial positions on the lane axis
    # wsT_ref: (C, C)  transposed state->state weight (VMEM-resident across steps)
    # act_ref: (C, 1)  per-batch action term: action_repr @ Wa + bias
    # out_ref: (C, T)  next-state tile
    s = s_ref[...]
    h = jnp.dot(wsT_ref[...], s, preferred_element_type=jnp.float32)  # (C, T) on MXU
    h = h + act_ref[...]                 # lane-broadcast of the per-batch action term
    h = jnp.maximum(h, 0.0)              # ReLU
    out_ref[...] = (h + s).astype(out_ref.dtype)   # residual connection


def dynamics_forward(prev_state, action_repr, w_state, w_action, bias, *, tile_cap=4096):
    """prev_state: (B, C, H, W) f32 NCHW; action_repr: (B, A) f32 -> (B, C, H, W)."""
    B, C, H, W = prev_state.shape
    HW = H * W

    # Tiny per-batch precompute, hoisted out of the spatial loop (was H*W-times
    # redundant inside the old kernel and required a materialized jnp.repeat).
    act_term = (jnp.dot(action_repr, w_action, preferred_element_type=jnp.float32)
                + bias[None, :]).reshape(B, C, 1)
    wsT = jnp.transpose(w_state)                       # (C, C)

    # Channels-first: NCHW -> (B, C, HW). Pure reshape, no transpose; the spatial
    # axis maps to TPU lanes so output stores are lane-dense.
    s = prev_state.reshape(B, C, HW)

    tile, hw_pad = _pick_tile(HW, tile_cap)
    if hw_pad != HW:
        s = jnp.pad(s, ((0, 0), (0, 0), (0, hw_pad - HW)))
    n_tiles = hw_pad // tile

    out = pl.pallas_call(
        dynamics_kernel,
        out_shape=jax.ShapeDtypeStruct((B, C, hw_pad), jnp.float32),
        grid_spec=pltpu.PrefetchScalarGridSpec(
            num_scalar_prefetch=0,
            grid=(B, n_tiles),
            in_specs=[
                pl.BlockSpec((None, C, tile), lambda b, t: (b, 0, t)),  # state tile
                pl.BlockSpec((C, C), lambda b, t: (0, 0)),              # Ws^T (resident)
                pl.BlockSpec((None, C, 1), lambda b, t: (b, 0, 0)),     # action term
            ],
            out_specs=pl.BlockSpec((None, C, tile), lambda b, t: (b, 0, t)),
        ),
        compiler_params=pltpu.CompilerParams(
            dimension_semantics=("parallel", "parallel")),   # v7x: 2 TCs share the grid
        input_output_aliases={0: 0},   # in-place residual update of the state buffer
    )(s, wsT, act_term)

    if hw_pad != HW:
        out = out[:, :, :HW]
    return out.reshape(B, C, H, W)


def reference_forward(prev_state, action_repr, w_state, w_action, bias):
    B, C, H, W = prev_state.shape
    s = jnp.transpose(prev_state, (0, 2, 3, 1)).reshape(B * H * W, C)
    a = jnp.repeat(action_repr, H * W, axis=0)
    h = jax.nn.relu(
        jnp.dot(s, w_state, precision=jax.lax.Precision.HIGHEST)
        + jnp.dot(a, w_action, precision=jax.lax.Precision.HIGHEST)
        + bias[None, :])
    return jnp.transpose((h + s).reshape(B, H, W, C), (0, 3, 1, 2))


if __name__ == "__main__":
    # Small shapes consistent with the module: per-pixel state channels + action embedding.
    B, C, H, W, A = 2, 32, 16, 16, 16    # spatial rows per batch = 256 (lane-dense tiles)

    key = jax.random.PRNGKey(0)
    k1, k2, k3, k4, k5 = jax.random.split(key, 5)
    prev_state = jax.random.normal(k1, (B, C, H, W), dtype=jnp.float32)
    action_repr = jax.random.normal(k2, (B, A), dtype=jnp.float32)
    # Deterministic synthetic parameters (the spec is abstract; no checkpoint).
    w_state = jax.random.normal(k3, (C, C), dtype=jnp.float32) * 0.1
    w_action = jax.random.normal(k4, (A, C), dtype=jnp.float32) * 0.1
    bias = jax.random.normal(k5, (C,), dtype=jnp.float32) * 0.01

    out = dynamics_forward(prev_state, action_repr, w_state, w_action, bias)
    out = jax.block_until_ready(out)

    ref = reference_forward(prev_state, action_repr, w_state, w_action, bias)
    assert out.shape == (B, C, H, W)
    assert jnp.allclose(out, ref, atol=1e-4, rtol=1e-4), \
        float(jnp.max(jnp.abs(out - ref)))

    print("KERNEL_OK")
</pallas_src>

<mosaic_0001>
module attributes {stable_mosaic.version = 11 : i64} {
  func.func @dynamics_kernel(%arg0: i32, %arg1: i32, %arg2: memref<1x32x256xf32, #tpu.memory_space<vmem>>, %arg3: memref<32x32xf32, #tpu.memory_space<vmem>>, %arg4: memref<1x32x1xf32, #tpu.memory_space<vmem>>, %arg5: memref<1x32x256xf32, #tpu.memory_space<vmem>>) attributes {dimension_semantics = [#tpu.dimension_semantics<parallel>, #tpu.dimension_semantics<parallel>], iteration_bounds = array<i64: 2, 1>, scalar_prefetch = 0 : i64, scratch_operands = 0 : i64, tpu.core_type = #tpu.core_type<tc>, window_params = [{transform_indices = @transform_0, window_bounds = array<i64: 1, 32, 256>}, {pipeline_mode = #tpu.pipeline_mode<synchronous>, transform_indices = @transform_1, window_bounds = array<i64: 32, 32>}, {transform_indices = @transform_2, window_bounds = array<i64: 1, 32, 1>}, {transform_indices = @transform_3, window_bounds = array<i64: 1, 32, 256>}]} {
    %c0 = arith.constant 0 : index
    %c0_0 = arith.constant 0 : index
    %c0_1 = arith.constant 0 : index
    %0 = vector.load %arg2[%c0, %c0_0, %c0_1] : memref<1x32x256xf32, #tpu.memory_space<vmem>>, vector<1x32x256xf32>
    %1 = vector.shape_cast %0 : vector<1x32x256xf32> to vector<32x256xf32>
    %c0_2 = arith.constant 0 : index
    %c0_3 = arith.constant 0 : index
    %2 = vector.load %arg3[%c0_2, %c0_3] : memref<32x32xf32, #tpu.memory_space<vmem>>, vector<32x32xf32>
    %cst = arith.constant dense<0.000000e+00> : vector<32x256xf32>
    %3 = tpu.matmul %2, %1, %cst {dimension_numbers = #tpu.dot_dimension_numbers<[1], [0], [0], [1], [0, 0, 1, 1], [], []>} : vector<32x32xf32>, vector<32x256xf32>, vector<32x256xf32> -> vector<32x256xf32>
    %c0_4 = arith.constant 0 : index
    %c0_5 = arith.constant 0 : index
    %c0_6 = arith.constant 0 : index
    %4 = vector.load %arg4[%c0_4, %c0_5, %c0_6] : memref<1x32x1xf32, #tpu.memory_space<vmem>>, vector<1x32x1xf32>
    %5 = vector.shape_cast %4 : vector<1x32x1xf32> to vector<32x1xf32>
    %6 = vector.broadcast %5 : vector<32x1xf32> to vector<32x256xf32>
    %7 = arith.addf %3, %6 : vector<32x256xf32>
    %cst_7 = arith.constant 0.000000e+00 : f32
    %8 = vector.broadcast %cst_7 : f32 to vector<32x256xf32>
    %9 = arith.maximumf %7, %8 : vector<32x256xf32>
    %10 = arith.addf %9, %1 : vector<32x256xf32>
    %c0_8 = arith.constant 0 : index
    %c0_9 = arith.constant 0 : index
    %c0_10 = arith.constant 0 : index
    %11 = vector.load %arg5[%c0_8, %c0_9, %c0_10] : memref<1x32x256xf32, #tpu.memory_space<vmem>>, vector<1x32x256xf32>
    %12 = vector.shape_cast %11 : vector<1x32x256xf32> to vector<32x256xf32>
    %13 = vector.shape_cast %10 : vector<32x256xf32> to vector<1x32x256xf32>
    tpu.vector_store %arg5[%c0_8, %c0_9, %c0_10], %13 {strides = array<i32>} : memref<1x32x256xf32, #tpu.memory_space<vmem>>, vector<1x32x256xf32>,
    return
  }
  func.func @transform_0(%arg0: i32, %arg1: i32) -> (i32, i32, i32) {
    %c0_i32 = arith.constant 0 : i32
    %c0_i32_0 = arith.constant 0 : i32
    return %arg0, %c0_i32, %arg1 : i32, i32, i32
  }
  func.func @transform_1(%arg0: i32, %arg1: i32) -> (i32, i32) {
    %c0_i32 = arith.constant 0 : i32
    %c0_i32_0 = arith.constant 0 : i32
    %c0_i32_1 = arith.constant 0 : i32
    return %c0_i32, %c0_i32_0 : i32, i32
  }
  func.func @transform_2(%arg0: i32, %arg1: i32) -> (i32, i32, i32) {
    %c0_i32 = arith.constant 0 : i32
    %c0_i32_0 = arith.constant 0 : i32
    %c0_i32_1 = arith.constant 0 : i32
    return %arg0, %c0_i32, %c0_i32_0 : i32, i32, i32
  }
  func.func @transform_3(%arg0: i32, %arg1: i32) -> (i32, i32, i32) {
    %c0_i32 = arith.constant 0 : i32
    %c0_i32_0 = arith.constant 0 : i32
    return %arg0, %c0_i32, %arg1 : i32, i32, i32
  }
}

</mosaic_0001>

<bundles_post_ra>
// kernel: tpu_custom_call.1
= control target key start
LH: loop header
LB: loop body
LE: loop exit
PB: predicated region body
PF: predicated region fallthrough
CT: control target
= control target key end

     0   :  { %8 = vsyncpa [#allocation3], 0  ;;  %s942_s0 = inlined_call_operand.hbm [shape: f32[2,32,256], index: 0, kind: input, shape index: {}, may-alias: {0,3}]   ;;  %s943_s1 = inlined_call_operand.vmem [shape: f32[32,32], index: 1, kind: input, shape index: {}]   ;;  %s944_s2 = inlined_call_operand.vmem [shape: f32[2,32,1], index: 2, kind: input, shape index: {}]   ;;  %s945_s3 = inlined_call_operand.hbm [shape: f32[2,32,256], index: 3, kind: output, shape index: {}, may-alias: {0,3}]  }
   0x1   :  { %10 = vsyncpa [#allocation3 + $0x1], 0 }
   0x2   :  { %11 = vsyncpa [#allocation4], 0 }
   0x3   :  { %13 = vsyncpa [#allocation4 + $0x1], 0  ;;  %s746_s12 = smov 0   ;;  %s748_s13 = smov 0  }
   0x4   :  { %s750_s14 = smov 0   ;;  %s752_s15 = smov 0  }
   0x5   :  { %s754_s16 = smov 0   ;;  %s756_s17 = smov 0  }
   0x6 LB: > { %s506_s18 = sadd.s32 4294967295, %s716_s17   ;;  %s507_s19 = sadd.s32 4294967294, %s716_s17   ;;  %s716_s17 = sphi %s756_s17, %s19_s17   ;;  %s712_s16 = sphi %s754_s16, %s956_s16   ;;  %s708_s15 = sphi %s752_s15, %s955_s15   ;;  %s704_s14 = sphi %s750_s14, %s954_s14   ;;  %s700_s13 = sphi %s748_s13, %s953_s13   ;;  %s696_s12 = sphi %s746_s12, %s952_s12  }
   0x7   : > { %s31_s20 = sadd.s32 1, %s712_s16  ;;  %s40_s21 = sadd.s32 1, %s704_s14 }
   0x8   : > { %p33_p0 = scmp.ge.s32.totalorder %s31_s20, 2  ;;  %p47_p1 = scmp.ne.s32.totalorder %s704_s14, %s700_s13 }
   0x9   : > { %p48_p2 = scmp.eq.s32.totalorder %s716_s17, 0  ;;  %p53_p3 = scmp.ne.s32.totalorder %s700_s13, %s696_s12 }
   0xa   : > { %s958_s20 = smov (%p33_p0, %s31_s20), 0  ;;  %p54_p5 = scmp.eq.s32.totalorder %s506_s18, 0 }
   0xb   : > { %p787_p4 = por %p48_p2, %p47_p1  ;;  %s35_s23 = ssub.s32 %s712_s16, %s958_s20 }
   0xc   : > { %p126_p6 = scmp.eq.s32.totalorder %s506_s18, 1  ;;  %p38_p7 = scmp.eq.s32.totalorder %s35_s23, 0 }
   0xd   : > { %p793_p8 = por %p54_p5, %p53_p3  ;;  %p132_p10 = scmp.eq.s32.totalorder %s507_s19, 1 }
   0xe   : > { %p797_p9 = por %p126_p6, %p47_p1  ;;  %p550_p13 = scmp.lt.s32.totalorder %s716_s17, 2 }
   0xf   : > { %s802_s26 = scalar_select %p38_p7, %s704_s14, %s40_s21  }
  0x10   : > { %p804_p11 = por %p132_p10, %p53_p3  ;;  %s155_s28 = sand.u32 1, %s704_s14  }
  0x11   : > { %s510_s29 = sshll.u32 %s155_s28, 6  ;;  %s527_s30 = sshll.u32 %s712_s16, 10 }
  0x12   : > { %s167_s6 = scalar_lea.hbm %s942_s0, %s527_s30  ;;  %s159_s7 = scalar_lea.vmem [#allocation2], %s510_s29 }
  0x13   : > { %s168_s8 = sshll.u32 %s159_s7, 4  ;;  %p817_p0 = pnand %p550_p13, %p787_p4  ;;  %s169_s8 = int_to_ptr.vmem [resolvable:$true] %s168_s8 }
  0x14   : > { %p513_p1 = scmp.ge.s32.totalorder %s716_s17, 1  ;;  %s156_s10 = scalar_lea.sflag [#allocation3], %s155_s28 }
  0x15   : > { %p610_p2 = pneg %p817_p0  ;;  %s621_s11 = scalar_lea.vmem %s169_s8, 1024 }
  0x16   : > { %p622_p3 = scmp.ne.s32.totalorder %s169_s8, %s621_s11  ;;  %s718_s18 = smov [#allocation2]  }
  0x17   : > { %s626_s19 = sshll.u32 %s718_s18, 4  ;;  %s627_s19 = int_to_ptr.vmem [resolvable:$false] %s626_s19 }
  0x18   : > { %p624_p5 = pnand %p622_p3, %p610_p2  ;;  %s628_s21 = scalar_lea.vmem %s627_s19, 2048 }
  0x19   : > { %p629_p7 = scmp.lt.s32.totalorder %s169_s8, %s627_s19  ;;  %p630_p10 = scmp.lt.s32.totalorder %s628_s21, %s621_s11 }
  0x1a   : > { %p625_p6 = pneg %p624_p5 }
  0x1b   : > { %p631_p12 = por %p630_p10, %p629_p7 }
  0x1d   : > { %p632_p4 = pnand %p631_p12, %p625_p6 }
  0x1f   : > { %635 = shalt.err (!%p632_p4)
}
  0x20   : > { %s719_s22 = smov 256   ;;  %s720_s23 = smov 16  }
  0x21   : > { %545 = dma.hbm_to_vmem [thread:$0]  (!%p817_p0), %s167_s6, 1024, %s169_s8, %s156_s10, %s719_s22, %s719_s22, %s720_s23  }
  0x22   : > { %p184_p13 = scmp.lt.s32.totalorder %s716_s17, 3 }
  0x24   : > { %p185_p2 = pnand %p513_p1, %p184_p13 }
  0x25   : > { %s830_s28 = sand.u32 (!%p185_p2), 1, %s700_s13  }
  0x26   : > { %188 = sbr.rel (%p185_p2) target bundleno = 275 (0x113), region = 32  ;;  %s514_s29 = sshll.u32 (!%p185_p2), %s830_s28, 6 }
  0x27   : > { %s191_s30 = scalar_lea.sflag (!%p185_p2), [#allocation3], %s830_s28  ;;  %s194_s4 = scalar_lea.vmem (!%p185_p2), [#allocation2], %s514_s29 }
  0x2b   : > { %687 = dma.done.wait (%p793_p8), %s191_s30, 1024  }
  0x2c   : > { %689 = vsyncadd (%p793_p8), %s191_s30, 4294966272  ;;  %v721_v0 = vmov 0.0   ;;  %p223_p12 = scmp.lt.s32.totalorder %s708_s15, 1  ;;  %v722_v1 = vmov 0   ;;  %v842_v2 = vld [vmem:[%s194_s4 + $0x38] sm:$0xff]  ;;  %v844_v3 = vld [vmem:[%s194_s4 + $0x30] sm:$0xff] }
  0x2d   : > { %342 = vmatprep.mubr.f32.mxu0 %v721_v0  ;;  %354 = vmatprep.mubr.f32.mxu1 %v721_v0  ;;  %v846_v4 = vld [vmem:[%s194_s4 + $0x28] sm:$0xff]  ;;  %v233_v5 = vld [vmem:[%s194_s4 + $0x20] sm:$0xff]  ;;  %v852_v6 = vld [vmem:[%s194_s4 + $0x18] sm:$0xff]  ;;  %vm265_vm0 = vcmask 261120   ;;  %s221_s30 = scalar_lea.vmem [#allocation5], %s514_s29  ;;  %s392_s6 = scalar_lea.sflag [#allocation4], %s830_s28 }
  0x2e   : > { %607 = vset.pattern.permute.xlu1 %v722_v1  ;;  %606 = vset.pattern.permute.xlu0 %v722_v1  ;;  %s224_s5 = scalar_select %p223_p12, %s708_s15, 1  ;;  %v856_v7 = vld [vmem:[%s194_s4 + $0x10] sm:$0xff]  ;;  %v230_v8 = vld [vmem:[%s194_s4 + $0x8] sm:$0xff]  ;;  %v229_v9 = vld [vmem:[%s194_s4] sm:$0xff] }
  0x2f   : > { %302 = vmatprep.subr.mxu0 %v842_v2  ;;  %530 = vmatprep.subr.mxu1 %v842_v2  ;;  %v237_v10 = vld [vmem:[%s943_s1] sm:$0xff]  ;;  %v239_v11 = vld [vmem:[%s943_s1 + $0x10] sm:$0xff]  ;;  %v238_v14 = vld [vmem:[%s943_s1 + $0x8] sm:$0xff]  ;;  %s407_s4 = sshll.u32 %s221_s30, 4  ;;  %s885_s4 = int_to_ptr.vmem [resolvable:$true] %s407_s4 }
  0x30   : > { %303 = vmatpush1.msra.mxu0 %v844_v3  ;;  %534 = vmatpush1.msra.mxu1 %v844_v3  ;;  %s528_s24 = sshll.u32 %s224_s5, 5  ;;  %v240_v15 = vld [vmem:[%s943_s1 + $0x18] sm:$0xff]  ;;  %s529_s5 = sshll.u32 %s708_s15, 10 }
  0x31   : > { %304 = vmatprep.subr.mxu0 %v846_v4  ;;  %531 = vmatprep.subr.mxu1 %v846_v4  ;;  %s227_s8 = scalar_lea.vmem %s944_s2, %s528_s24  ;;  %s892_s15 = scalar_lea.hbm %s945_s3, %s529_s5 }
  0x32   : > { %305 = vmatpush1.msra.mxu0 %v233_v5  ;;  %535 = vmatpush1.msra.mxu1 %v233_v5  ;;  %v243_v12 = vld [vmem:[%s227_s8 + $0x10] sm:$0xff]  ;;  %v241_v13 = vld [vmem:[%s227_s8] sm:$0xff]  ;;  %v244_v16 = vld [vmem:[%s227_s8 + $0x18] sm:$0xff]  ;;  %s636_s7 = scalar_lea.vmem %s885_s4, 1024 }
  0x33   : > { %306 = vmatprep.subr.mxu0 %v852_v6  ;;  %532 = vmatprep.subr.mxu1 %v852_v6  ;;  %v242_v17 = vld [vmem:[%s227_s8 + $0x8] sm:$0xff]  ;;  %p637_p8 = scmp.ne.s32.totalorder %s885_s4, %s636_s7  ;;  %s723_s8 = smov [#allocation5]  }
  0x34   : > { %307 = vmatpush1.msra.mxu0 %v856_v7  ;;  %536 = vmatpush1.msra.mxu1 %v856_v7  ;;  %s640_s9 = sshll.u32 %s723_s8, 4  ;;  %s641_s9 = int_to_ptr.vmem [resolvable:$false] %s640_s9 }
  0x35   : > { %308 = vmatprep.subr.mxu0 %v230_v8  ;;  %533 = vmatprep.subr.mxu1 %v230_v8  ;;  %p638_p0 = pnand %p637_p8, %p797_p9  ;;  %s642_s10 = scalar_lea.vmem %s641_s9, 2048 }
  0x36   : > { %309 = vmatpush1.msra.mxu0 %v229_v9  ;;  %537 = vmatpush1.msra.mxu1 %v229_v9  ;;  %p643_p3 = scmp.lt.s32.totalorder %s885_s4, %s641_s9  ;;  %p644_p5 = scmp.lt.s32.totalorder %s642_s10, %s636_s7 }
  0x37   : > { %518 = vmatmul.mubr.msk.f32.vlgmr.msra.gmra.mxu0 %vm265_vm0, %v237_v10  ;;  %520 = vmatmul.mubr.msk.f32.vlgmr.msra.gmra.mxu1 %vm265_vm0, %v239_v11  ;;  %p639_p1 = pneg %p638_p0 }
  0x38   : > { %348 = vmatprep.mubr.f32.mxu0 %v721_v0  ;;  %360 = vmatprep.mubr.f32.mxu1 %v721_v0  ;;  %p645_p6 = por %p644_p5, %p643_p3 }
  0x39   : > { %257 = vperm.xlu1 %607, %v243_v12   ;;  %247 = vperm.xlu0 %606, %v241_v13  }
  0x3a   : > { %p646_p7 = pnand %p645_p6, %p639_p1 }
  0x3b   : > { %519 = vmatmul.mubr.msk.f32.gmra.mxu0 %vm265_vm0, %v238_v14  ;;  %521 = vmatmul.mubr.msk.f32.gmra.mxu1 %vm265_vm0, %v240_v15 }
  0x3d   : > { %262 = vperm.xlu1 %607, %v244_v16   ;;  %252 = vperm.xlu0 %606, %v242_v17  }
  0xb4   : > { %v258_v18 = vpop.permute.xlu1 %257  ;;  %v248_v19 = vpop.permute.xlu0 %247 }
  0xb8   : > { %v263_v34 = vpop.permute.xlu1 %262  ;;  %v253_v35 = vpop.permute.xlu0 %252 }
  0xf7   : > { %v344_v20 = vpop.f32.mrf.mxu0  ;;  %v356_v21 = vpop.f32.mrf.mxu1 }
  0xf8   : > { %v345_v22 = vadd.f32 %v344_v20, %v248_v19  ;;  %v357_v23 = vadd.f32 %v356_v21, %v258_v18 }
  0xf9   : > { %v346_v24 = vpop.f32.mrf.mxu0  ;;  %v358_v25 = vpop.f32.mrf.mxu1 }
  0xfa   : > { %v367_v26 = vmax.f32 %v345_v22, 0.0  ;;  %v371_v27 = vmax.f32 %v357_v23, 0.0  ;;  %v347_v28 = vadd.f32 %v346_v24, %v248_v19  ;;  %v359_v29 = vadd.f32 %v358_v25, %v258_v18 }
  0xfb   : > { %v350_v30 = vpop.f32.mrf.mxu0  ;;  %v362_v31 = vpop.f32.mrf.mxu1 }
  0xfc   : > { %v375_v32 = vadd.f32 %v367_v26, %v229_v9  ;;  %v379_v33 = vadd.f32 %v371_v27, %v233_v5  ;;  %v368_v36 = vmax.f32 %v347_v28, 0.0  ;;  %v372_v37 = vmax.f32 %v359_v29, 0.0 }
  0xfd   : > { %v351_v38 = vadd.f32 %v350_v30, %v253_v35  ;;  %v363_v39 = vadd.f32 %v362_v31, %v263_v34  ;;  %v352_v40 = vpop.f32.mrf.mxu0  ;;  %v364_v41 = vpop.f32.mrf.mxu1 }
  0xfe   : > { %383 = vst [vmem:[%s221_s30] sm:$0xff] %v375_v32  ;;  %387 = vst [vmem:[%s221_s30 + $0x20] sm:$0xff] %v379_v33  ;;  %v376_v42 = vadd.f32 %v368_v36, %v230_v8  ;;  %v380_v43 = vadd.f32 %v372_v37, %v846_v4  ;;  %v353_v44 = vadd.f32 %v352_v40, %v253_v35 }
  0xff   : > { %v365_v45 = vadd.f32 %v364_v41, %v263_v34  ;;  %v369_v46 = vmax.f32 %v351_v38, 0.0  ;;  %v373_v47 = vmax.f32 %v363_v39, 0.0 }
 0x100   : > { %384 = vst [vmem:[%s221_s30 + $0x8] sm:$0xff] %v376_v42  ;;  %388 = vst [vmem:[%s221_s30 + $0x28] sm:$0xff] %v380_v43  ;;  %v370_v48 = vmax.f32 %v353_v44, 0.0 }
 0x101   : > { %v374_v49 = vmax.f32 %v365_v45, 0.0  ;;  %v377_v50 = vadd.f32 %v369_v46, %v856_v7  ;;  %v381_v51 = vadd.f32 %v373_v47, %v844_v3 }
 0x102   : > { %v378_v52 = vadd.f32 %v370_v48, %v852_v6 }
 0x103   : > { %v382_v53 = vadd.f32 %v374_v49, %v842_v2  ;;  %385 = vst [vmem:[%s221_s30 + $0x10] sm:$0xff] %v377_v50  ;;  %389 = vst [vmem:[%s221_s30 + $0x30] sm:$0xff] %v381_v51 }
 0x104   : > { %386 = vst [vmem:[%s221_s30 + $0x18] sm:$0xff] %v378_v52 }
 0x105   : > { %390 = vst [vmem:[%s221_s30 + $0x38] sm:$0xff] %v382_v53 }
 0x106   : > { %649 = shalt.err (!%p646_p7)
}
 0x107   : > { %s650_s11 = scalar_lea.hbm %s892_s15, 1024  ;;  %s654_s21 = scalar_lea.hbm %s945_s3, 2048 }
 0x108   : > { %p651_p10 = scmp.ne.s32.totalorder %s892_s15, %s650_s11  ;;  %p655_p2 = scmp.lt.s32.totalorder %s892_s15, %s945_s3 }
 0x109   : > { %p656_p12 = scmp.lt.s32.totalorder %s654_s21, %s650_s11 }
 0x10a   : > { %p652_p4 = pnand %p651_p10, %p797_p9 }
 0x10b   : > { %p657_p8 = por %p656_p12, %p655_p2 }
 0x10c   : > { %p653_p13 = pneg %p652_p4 }
 0x10e   : > { %p658_p0 = pnand %p657_p8, %p653_p13 }
 0x110   : > { %661 = shalt.err (!%p658_p0)
}
 0x111   : > { %s724_s30 = smov 256   ;;  %s725_s5 = smov 16  }
 0x112   : > { %540 = dma.vmem_to_hbm [thread:$0]  (%p797_p9), %s885_s4, 1024, %s892_s15, %s392_s6, %s724_s30, %s724_s30, %s725_s5  }
 0x113 PF: > { %s422_s29 = sand.u32 1, %s696_s12   ;;  %p951_p1 = scmp.ge.s32.totalorder %s716_s17, 2 }
 0x114   : > { %s423_s24 = scalar_lea.sflag [#allocation4], %s422_s29 }
 0x115   : > { %p547_p3 = pnand %p951_p1, %p804_p11 }
 0x117   : > { %p548_p5 = pneg %p547_p3 }
 0x119   : > { %691 = dma.done.wait (%p548_p5), %s423_s24, 1024  }
 0x11a   : > { %693 = vsyncadd (%p548_p5), %s423_s24, 4294966272  ;;  %s19_s17 = sadd.s32 1, %s716_s17   ;;  %s952_s12 = smov %s700_s13 }
 0x11b   : > { %p16_p6 = scmp.ge.s32.totalorder %s19_s17, 4   ;;  %s953_s13 = smov %s704_s14 }
 0x11c   : > { %s954_s14 = smov %s802_s26  ;;  %s955_s15 = smov %s712_s16 }
 0x11d   : > { %s956_s16 = smov %s958_s20  ;;  %18 = sbr.rel (!%p16_p6) target bundleno = 6 (0x6), region = 80 }
 0x122   :  { %428 = vsyncpa [#allocation3], 1 }
 0x123   :  { %430 = vsyncpa [#allocation3 + $0x1], 1 }
 0x124   :  { %431 = vsyncpa [#allocation4], 1 }
 0x125   :  { %433 = vsyncpa [#allocation4 + $0x1], 1 }

</bundles_post_ra>
